<compile_context>
chip_gen: v6e
topology: v6e:2x2x1
jax: 0.10.0
libtpu: 0.0.40
codegen_flags: <defaults>
</compile_context>

<pallas_src>
import functools

import jax
import jax.numpy as jnp
from jax import lax
from jax.experimental import pallas as pl
from jax.experimental.pallas import tpu as pltpu


def _norm_mlp_kernel(xt_ref, w1t_ref, b1_ref, w2t_ref, b2_ref, ot_ref, *,
                     chunk, tanh_dtype):
    """One batch tile of the folded MLP, batch on the lane axis.

    xt_ref : (D, TN)  input tile, batch on lanes
    w1t_ref: (H, D)   first-layer weights (transposed), VMEM-resident
    b1_ref : (H, 1)
    w2t_ref: (O, H)   second-layer weights with normalization folded in
    b2_ref : (O, 1)
    ot_ref : (O, TN)  output tile, batch on lanes (lane-dense stores)
    """
    h_dim = w1t_ref.shape[0]
    o_dim = w2t_ref.shape[0]
    tn = xt_ref.shape[1]
    n_chunks = tn // chunk

    # Hoisted out of the chunk loop: weight loads and bias broadcasts
    # (JAX does not CSE broadcast_in_dim inside loops).
    w1t = w1t_ref[...]
    w2t = w2t_ref[...]
    b1b = jnp.broadcast_to(b1_ref[...], (h_dim, chunk))
    b2b = jnp.broadcast_to(b2_ref[...], (o_dim, chunk))

    def body(c, carry):
        start = pl.multiple_of(c * chunk, chunk)
        xc = xt_ref[:, pl.ds(start, chunk)]                          # (D, chunk)
        pre = jnp.dot(w1t, xc, preferred_element_type=jnp.float32) + b1b
        h = jnp.tanh(pre.astype(tanh_dtype))                         # (H, chunk)
        y = jnp.dot(w2t, h, preferred_element_type=jnp.float32) + b2b
        ot_ref[:, pl.ds(start, chunk)] = y.astype(ot_ref.dtype)      # (O, chunk)
        return carry

    lax.fori_loop(0, n_chunks, body, 0, unroll=min(4, n_chunks))


_TILE_LADDER = (65536, 32768, 16384, 8192, 4096, 2048, 1024, 512, 256, 128)
_CHUNK = 512  # lanes per inner-loop chunk -> (32, 512) f32 hidden = 16 vregs


def _choose_tile(n):
    """Largest ladder tile that still leaves >= 2 grid steps after padding."""
    for t in _TILE_LADDER:
        if n >= 2 * t:
            return t
    return 128


def _round_up(n, m):
    return ((n + m - 1) // m) * m


def _default_tanh_dtype():
    """bf16 tanh on chips with a bf16 EUP (v6e / v7x); f32 elsewhere (v5e...)."""
    try:
        kind = jax.devices()[0].device_kind.lower()
    except Exception:
        return jnp.float32
    if any(tag in kind for tag in ("v6", "v7", "7x")):
        return jnp.bfloat16
    return jnp.float32


def normalization_forward(x, params, xrange=1.0, *, tanh_dtype=None):
    """Pallas equivalent of Normalization(xrange).forward(net, x).

    `params = (w1, b1, w2, b2)` are the weights of the wrapped
    Linear -> tanh -> Linear net.  `tanh_dtype=None` auto-selects bf16 on
    v6e/v7x and f32 otherwise; pass jnp.float32 explicitly for bit-faithful
    reference numerics.
    """
    if tanh_dtype is None:
        tanh_dtype = _default_tanh_dtype()

    w1, b1, w2, b2 = params
    n, d = x.shape
    hdim = w1.shape[1]
    o = w2.shape[1]
    dtype = x.dtype

    # ---- Fold the boundary normalization into the second layer (pure algebra,
    # computed once per (params, xrange); two 1-row net evals are negligible).
    xmin = jnp.full((1, d), -xrange, dtype=jnp.float32)
    xmax = jnp.full((1, d), xrange, dtype=jnp.float32)

    def net(v):
        return jnp.tanh(v @ w1 + b1) @ w2 + b2

    y_min = net(xmin)                # (1, O)
    y_gap = net(xmax) - y_min        # (1, O)
    s = 2.0 / y_gap                  # NOTE: same inf/nan behaviour as the
    w2f = w2 * s                     #       reference when y_gap ~ 0 (the fold
    b2f = (b2 - y_min) * s - 1.0     #       amplifies W2/b2 instead of dividing).

    # ---- Kernel-side layouts (batch on lanes).  x / out transposes stay in
    # the wrapper; see header comment for the D = O = 4 cost analysis.
    w1t = w1.T.astype(jnp.float32)                 # (H, D)  VMEM-resident
    b1c = b1.reshape(hdim, 1).astype(jnp.float32)  # (H, 1)
    w2tf = w2f.T.astype(tanh_dtype)                # (O, H)  folded, compute dtype
    b2c = b2f.reshape(o, 1).astype(jnp.float32)    # (O, 1)

    # ---- Tiling: big lane tiles (amortize ~0.35us/step); pad N so the grid
    # always has >= 2 parallel steps (pipelining + both v7x TensorCores).
    tn = _choose_tile(n)
    n_pad = max(_round_up(n, tn), 2 * tn)
    chunk = min(_CHUNK, tn)

    xt = x.T                                       # (D, N): one fused HBM pass
    if n_pad != n:
        xt = jnp.pad(xt, ((0, 0), (0, n_pad - n)))

    grid = (pl.cdiv(n_pad, tn),)
    resident = lambda shape: pl.BlockSpec(shape, lambda i: (0, 0))

    kernel = functools.partial(_norm_mlp_kernel, chunk=chunk,
                               tanh_dtype=tanh_dtype)

    out_t = pl.pallas_call(
        kernel,
        out_shape=jax.ShapeDtypeStruct((o, n_pad), dtype),
        grid=grid,
        in_specs=[
            pl.BlockSpec((d, tn), lambda i: (0, i)),   # x^T tile
            resident((hdim, d)),                       # W1^T
            resident((hdim, 1)),                       # b1
            resident((o, hdim)),                       # W2'^T (folded)
            resident((o, 1)),                          # b2'   (folded)
        ],
        out_specs=pl.BlockSpec((o, tn), lambda i: (0, i)),
        compiler_params=pltpu.CompilerParams(
            dimension_semantics=("parallel",),
            vmem_limit_bytes=32 * 1024 * 1024,
        ),
    )(xt, w1t, b1c, w2tf, b2c)

    return out_t[:, :n].T                          # (N, O)


def _reference_forward(x, params, xrange=1.0):
    """Pure-JAX reference mirroring the PyTorch module semantics."""
    w1, b1, w2, b2 = params

    def net(v):
        return jnp.tanh(v @ w1 + b1) @ w2 + b2

    d = x.shape[1]
    xmin = -jnp.ones((1, d), x.dtype) * xrange
    xmax = jnp.ones((1, d), x.dtype) * xrange
    y_gap = net(xmax) - net(xmin)
    return (net(x) - net(xmin)) / y_gap * 2.0 - 1.0


if __name__ == "__main__":
    key = jax.random.PRNGKey(0)
    k_x, k_w1, k_b1, k_w2, k_b2, k_x2 = jax.random.split(key, 6)

    # Small shapes consistent with the module: batch=8, in-dim=4, hidden=32,
    # out-dim=4.  Positive W1/W2 keep y_gap well away from 0 so the folded
    # scale s = 2/y_gap is O(1) and the bf16-tanh tolerance below is meaningful.
    N, D, H, O = 8, 4, 32, 4
    XRANGE = 1.0

    x = jax.random.uniform(k_x, (N, D), jnp.float32, minval=-1.0, maxval=1.0)
    w1 = jnp.abs(jax.random.normal(k_w1, (D, H), jnp.float32)) * 0.5 + 0.05
    b1 = jax.random.normal(k_b1, (1, H), jnp.float32) * 0.1
    w2 = jnp.abs(jax.random.normal(k_w2, (H, O), jnp.float32)) * 0.5 + 0.05
    b2 = jax.random.normal(k_b2, (1, O), jnp.float32) * 0.1
    params = (w1, b1, w2, b2)

    ref = _reference_forward(x, params, xrange=XRANGE)

    # 1) f32 tanh: bit-faithful structure check (the weight fold only
    #    reassociates the normalization arithmetic).
    fwd_f32 = jax.jit(functools.partial(normalization_forward, xrange=XRANGE,
                                        tanh_dtype=jnp.float32))
    out_f32 = jax.block_until_ready(fwd_f32(x, params))
    assert out_f32.shape == (N, O)
    assert jnp.allclose(out_f32, ref, atol=1e-4, rtol=1e-4), \
        "f32 kernel mismatch vs JAX reference"

    # 2) Default (auto) tanh dtype: bf16 on v6e/v7x, f32 elsewhere.
    fwd_auto = jax.jit(functools.partial(normalization_forward, xrange=XRANGE))
    out_auto = jax.block_until_ready(fwd_auto(x, params))
    assert out_auto.shape == (N, O)
    assert jnp.allclose(out_auto, ref, atol=5e-2, rtol=5e-2), \
        "auto-dtype kernel mismatch vs JAX reference"

    # 3) Ragged, multi-tile batch: exercises padding, grid > 1 and the
    #    multi-chunk inner loop.
    N2 = 4133
    x2 = jax.random.uniform(k_x2, (N2, D), jnp.float32, minval=-1.0, maxval=1.0)
    ref2 = _reference_forward(x2, params, xrange=XRANGE)
    out2 = jax.block_until_ready(fwd_f32(x2, params))
    assert out2.shape == (N2, O)
    assert jnp.allclose(out2, ref2, atol=1e-4, rtol=1e-4), \
        "ragged-batch kernel mismatch vs JAX reference"

    print("KERNEL_OK")
</pallas_src>

<mosaic_0001>
module attributes {stable_mosaic.version = 11 : i64} {
  func.func @_norm_mlp_kernel(%arg0: i32, %arg1: memref<4x128xf32, #tpu.memory_space<vmem>>, %arg2: memref<32x4xf32, #tpu.memory_space<vmem>>, %arg3: memref<32x1xf32, #tpu.memory_space<vmem>>, %arg4: memref<4x32xf32, #tpu.memory_space<vmem>>, %arg5: memref<4x1xf32, #tpu.memory_space<vmem>>, %arg6: memref<4x128xf32, #tpu.memory_space<vmem>>) attributes {dimension_semantics = [#tpu.dimension_semantics<parallel>], iteration_bounds = array<i64: 2>, scalar_prefetch = 0 : i64, scratch_operands = 0 : i64, tpu.core_type = #tpu.core_type<tc>, window_params = [{transform_indices = @transform_0, window_bounds = array<i64: 4, 128>}, {pipeline_mode = #tpu.pipeline_mode<synchronous>, transform_indices = @transform_1, window_bounds = array<i64: 32, 4>}, {pipeline_mode = #tpu.pipeline_mode<synchronous>, transform_indices = @transform_2, window_bounds = array<i64: 32, 1>}, {pipeline_mode = #tpu.pipeline_mode<synchronous>, transform_indices = @transform_3, window_bounds = array<i64: 4, 32>}, {pipeline_mode = #tpu.pipeline_mode<synchronous>, transform_indices = @transform_4, window_bounds = array<i64: 4, 1>}, {transform_indices = @transform_5, window_bounds = array<i64: 4, 128>}]} {
    %c0 = arith.constant 0 : index
    %c0_0 = arith.constant 0 : index
    %0 = vector.load %arg2[%c0, %c0_0] : memref<32x4xf32, #tpu.memory_space<vmem>>, vector<32x4xf32>
    %c0_1 = arith.constant 0 : index
    %c0_2 = arith.constant 0 : index
    %1 = vector.load %arg4[%c0_1, %c0_2] : memref<4x32xf32, #tpu.memory_space<vmem>>, vector<4x32xf32>
    %c0_3 = arith.constant 0 : index
    %c0_4 = arith.constant 0 : index
    %2 = vector.load %arg3[%c0_3, %c0_4] : memref<32x1xf32, #tpu.memory_space<vmem>>, vector<32x1xf32>
    %3 = vector.shape_cast %2 : vector<32x1xf32> to vector<32x1xf32>
    %4 = vector.broadcast %3 : vector<32x1xf32> to vector<32x128xf32>
    %c0_5 = arith.constant 0 : index
    %c0_6 = arith.constant 0 : index
    %5 = vector.load %arg5[%c0_5, %c0_6] : memref<4x1xf32, #tpu.memory_space<vmem>>, vector<4x1xf32>
    %6 = vector.shape_cast %5 : vector<4x1xf32> to vector<4x1xf32>
    %7 = vector.broadcast %6 : vector<4x1xf32> to vector<4x128xf32>
    %c0_i32 = arith.constant 0 : i32
    %c128_i32 = arith.constant 128 : i32
    %8 = arith.muli %c0_i32, %c128_i32 : i32
    %9 = tpu.assume_multiple %8, 128 : i32
    %c0_7 = arith.constant 0 : index
    %10 = arith.index_cast %9 : i32 to index
    %11 = vector.load %arg1[%c0_7, %10] : memref<4x128xf32, #tpu.memory_space<vmem>>, vector<4x128xf32>
    %cst = arith.constant dense<0.000000e+00> : vector<32x128xf32>
    %12 = tpu.matmul %0, %11, %cst {dimension_numbers = #tpu.dot_dimension_numbers<[1], [0], [0], [1], [0, 0, 1, 1], [], []>} : vector<32x4xf32>, vector<4x128xf32>, vector<32x128xf32> -> vector<32x128xf32>
    %13 = arith.addf %12, %4 : vector<32x128xf32>
    %14 = math.tanh %13 : vector<32x128xf32>
    %cst_8 = arith.constant dense<0.000000e+00> : vector<4x128xf32>
    %15 = tpu.matmul %1, %14, %cst_8 {dimension_numbers = #tpu.dot_dimension_numbers<[1], [0], [0], [1], [0, 0, 1, 1], [], []>} : vector<4x32xf32>, vector<32x128xf32>, vector<4x128xf32> -> vector<4x128xf32>
    %16 = arith.addf %15, %7 : vector<4x128xf32>
    %c0_9 = arith.constant 0 : index
    %17 = arith.index_cast %9 : i32 to index
    %18 = vector.load %arg6[%c0_9, %17] : memref<4x128xf32, #tpu.memory_space<vmem>>, vector<4x128xf32>
    tpu.vector_store %arg6[%c0_9, %17], %16 {strides = array<i32>} : memref<4x128xf32, #tpu.memory_space<vmem>>, vector<4x128xf32>,
    %c1_i32 = arith.constant 1 : i32
    return
  }
  func.func @transform_0(%arg0: i32) -> (i32, i32) {
    %c0_i32 = arith.constant 0 : i32
    %c0_i32_0 = arith.constant 0 : i32
    return %c0_i32, %arg0 : i32, i32
  }
  func.func @transform_1(%arg0: i32) -> (i32, i32) {
    %c0_i32 = arith.constant 0 : i32
    %c0_i32_0 = arith.constant 0 : i32
    %c0_i32_1 = arith.constant 0 : i32
    return %c0_i32, %c0_i32_0 : i32, i32
  }
  func.func @transform_2(%arg0: i32) -> (i32, i32) {
    %c0_i32 = arith.constant 0 : i32
    %c0_i32_0 = arith.constant 0 : i32
    %c0_i32_1 = arith.constant 0 : i32
    return %c0_i32, %c0_i32_0 : i32, i32
  }
  func.func @transform_3(%arg0: i32) -> (i32, i32) {
    %c0_i32 = arith.constant 0 : i32
    %c0_i32_0 = arith.constant 0 : i32
    %c0_i32_1 = arith.constant 0 : i32
    return %c0_i32, %c0_i32_0 : i32, i32
  }
  func.func @transform_4(%arg0: i32) -> (i32, i32) {
    %c0_i32 = arith.constant 0 : i32
    %c0_i32_0 = arith.constant 0 : i32
    %c0_i32_1 = arith.constant 0 : i32
    return %c0_i32, %c0_i32_0 : i32, i32
  }
  func.func @transform_5(%arg0: i32) -> (i32, i32) {
    %c0_i32 = arith.constant 0 : i32
    %c0_i32_0 = arith.constant 0 : i32
    return %c0_i32, %arg0 : i32, i32
  }
}

</mosaic_0001>

<bundles_post_ra>
// kernel: normalization_forward.1
= control target key start
LH: loop header
LB: loop body
LE: loop exit
PB: predicated region body
PF: predicated region fallthrough
CT: control target
= control target key end

     0   :  { %s596_s18 = smov 0   ;;  %s654_s0 = inlined_call_operand.vmem [shape: f32[4,256], index: 0, kind: input, shape index: {}]   ;;  %s655_s1 = inlined_call_operand.vmem [shape: f32[32,4], index: 1, kind: input, shape index: {}]   ;;  %s656_s2 = inlined_call_operand.vmem [shape: f32[32,1], index: 2, kind: input, shape index: {}]   ;;  %s657_s3 = inlined_call_operand.vmem [shape: f32[4,32], index: 3, kind: input, shape index: {}]   ;;  %s658_s4 = inlined_call_operand.vmem [shape: f32[4,1], index: 4, kind: input, shape index: {}]   ;;  %s659_s5 = inlined_call_operand.vmem [shape: f32[4,256], index: 5, kind: output, shape index: {}]  }
   0x1 LB: > { %s490_s19 = sadd.s32 4294967295, %s561_s18   ;;  %p494_p0 = scmp.ge.s32.totalorder %s561_s18, 1  ;;  %s561_s18 = sphi %s596_s18, %s15_s18  }
   0x2   : > { %p186_p1 = scmp.lt.s32.totalorder %s561_s18, 3 }
   0x4   : > { %p187_p2 = pnand %p494_p0, %p186_p1 }
   0x5   : > { %p212_p3 = scmp.lt.s32.totalorder (!%p187_p2), %s490_s19, 1 }
   0x6   : > { %190 = sbr.rel (%p187_p2) target bundleno = 433 (0x1b1), region = 40 }
   0xb   : > { %v220_v0 = vld [vmem:[%s655_s1] sm:$0xff]  ;;  %vm256_vm0 = vcmask 31744   ;;  %v228_v1 = vld [vmem:[%s656_s2 + $0x18] sm:$0xff]  ;;  %s661_s19 = smov (!%p212_p3, %s490_s19), 1  ;;  %v563_v2 = vmov 0   ;;  %v226_v3 = vld [vmem:[%s656_s2 + $0x8] sm:$0xff] }
   0xc   : > { %517 = vmatprep.mubr.msk.f32.mxu0 %vm256_vm0, %v220_v0  ;;  %545 = vset.pattern.permute.xlu0 %v563_v2  ;;  %s495_s26 = sshll.u32 %s661_s19, 2  ;;  %vm269_vm1 = vcmask 1043456   ;;  %v227_v4 = vld [vmem:[%s656_s2 + $0x10] sm:$0xff]  ;;  %v225_v5 = vld [vmem:[%s656_s2] sm:$0xff]  ;;  %v221_v7 = vld [vmem:[%s655_s1 + $0x8] sm:$0xff]  ;;  %v564_v11 = vmov 0.0  }
   0xd   : > { %546 = vset.pattern.permute.xlu1 %v563_v2  ;;  %246 = vperm.xlu0 %545, %v228_v1   ;;  %s215_s6 = scalar_lea.vmem %s654_s0, %s495_s26  ;;  %v222_v8 = vld [vmem:[%s655_s1 + $0x10] sm:$0xff]  ;;  %v249_v9 = vld [vmem:[%s658_s4] sm:$0xf]  ;;  %v223_v10 = vld [vmem:[%s655_s1 + $0x18] sm:$0xff]  ;;  %vm565_vm2 = vmmov 0   ;;  %vm362_vm3 = vcmask 261120   ;;  %s219_s23 = scalar_lea.vmem %s659_s5, %s495_s26 }
   0xe   : > { %236 = vperm.xlu1 %546, %v226_v3   ;;  %v255_v6 = vld [vmem:[%s215_s6] sm:$0xf]  ;;  %523 = vmatprep.subr.mxu1 %v564_v11 }
   0xf   : > { %515 = vmatprep.subr.msk.mxu0 %vm269_vm1, %v255_v6  ;;  %531 = vmatprep.mubr.msk.f32.mxu1 %vm565_vm2, %v564_v11  ;;  %v224_v27 = vld [vmem:[%s657_s3] sm:$0xf] }
  0x10   : > { %516 = vmatpush3.msk.msra.mxu0 %vm269_vm1, %v255_v6 }
  0x11   : > { %241 = vperm.xlu0 %545, %v227_v4   ;;  %518 = vmatmul.mubr.msk.f32.vlgmr.msra.gmra.mxu0 %vm256_vm0, %v221_v7 }
  0x12   : > { %231 = vperm.xlu1 %546, %v225_v5   ;;  %520 = vmatprep.mubr.msk.f32.mxu0 %vm256_vm0, %v222_v8 }
  0x15   : > { %252 = vperm.xlu0 %545, %v249_v9   ;;  %521 = vmatmul.mubr.msk.f32.gmra.mxu0 %vm256_vm0, %v223_v10 }
  0x88   : > { %v247_v12 = vpop.permute.xlu0 %246 }
  0x89   : > { %v237_v13 = vpop.permute.xlu1 %236 }
  0x8c   : > { %v242_v17 = vpop.permute.xlu0 %241 }
  0x8d   : > { %v232_v19 = vpop.permute.xlu1 %231 }
  0x90   : > { %v253_v29 = vpop.permute.xlu0 %252 }
  0xd1   : > { %v519_v14 = vpop.f32.mrf.mxu0 }
  0xd2   : > { %v345_v21 = vadd.f32 %v519_v14, %v237_v13 }
  0xd3   : > { %v339_v15 = vpop.f32.mrf.mxu0 }
  0xd4   : > { %v340_v23 = vadd.f32 %v339_v15, %v232_v19 }
  0xd5   : > { %v522_v16 = vpop.f32.mrf.mxu0 }
  0xd6   : > { %v355_v18 = vadd.f32 %v522_v16, %v247_v12 }
  0xd7   : > { %v349_v20 = vpop.f32.mrf.mxu0 }
  0xd8   : > { %547 = vtanh.f32 %v355_v18  ;;  %v350_v22 = vadd.f32 %v349_v20, %v242_v17 }
  0xda   : > { %549 = vtanh.f32 %v350_v22 }
  0xdb   : > { %551 = vtanh.f32 %v345_v21 }
  0xdc   : > { %553 = vtanh.f32 %v340_v23 }
  0xe5   : > { %v548_v24 = vpop.eup %547 }
  0xe6   : > { %524 = vmatpush3.msra.mxu1 %v548_v24 }
  0xe7   : > { %v550_v25 = vpop.eup %549  ;;  %525 = vmatprep.subr.mxu1 %v564_v11 }
  0xe8   : > { %526 = vmatpush3.msra.mxu1 %v550_v25  ;;  %v552_v26 = vpop.eup %551 }
  0xe9   : > { %527 = vmatprep.subr.mxu1 %v564_v11  ;;  %v554_v28 = vpop.eup %553 }
  0xea   : > { %528 = vmatpush3.msra.mxu1 %v552_v26 }
  0xeb   : > { %529 = vmatprep.subr.mxu1 %v564_v11 }
  0xec   : > { %530 = vmatpush3.msra.mxu1 %v554_v28 }
  0xed   : > { %532 = vmatmul.mubr.msk.f32.vlgmr.msra.gmra.mxu1 %vm362_vm3, %v224_v27 }
 0x1ad   : > { %v432_v30 = vpop.f32.mrf.mxu1 }
 0x1ae   : > { %v433_v31 = vadd.f32 %v432_v30, %v253_v29 }
 0x1af   : > { %v533_v32 = vpop.f32.mrf.mxu1 }
 0x1b0   : > { %436 = vst [vmem:[%s219_s23] sm:$0xf] %v433_v31 }
 0x1b1 PF: > { %s15_s18 = sadd.s32 1, %s561_s18  }
 0x1b2   : > { %p12_p4 = scmp.ge.s32.totalorder %s15_s18, 4  }
 0x1b4   :  { %14 = sbr.rel (!%p12_p4) target bundleno = 1 (0x1), region = 70 }

</bundles_post_ra>
